<compile_context>
chip_gen: v7x
topology: tpu7x:2x2x1
jax: 0.10.0
libtpu: 0.0.40
codegen_flags: <defaults>
</compile_context>

<pallas_src>
import functools

import jax
import jax.numpy as jnp
from jax.experimental import pallas as pl
from jax.experimental.pallas import tpu as pltpu


def _round_up(x, m):
    return (x + m - 1) // m * m


def _vmem_capacity_bytes():
    """Physical VMEM of the local chip (fallback: conservative 64 MiB = v7x per-core)."""
    try:
        cap = getattr(pltpu.get_tpu_info(), "vmem_capacity_bytes", None)
        if cap:
            return int(cap)
    except Exception:
        pass
    return 64 << 20


def _vmem_limit(est, cap):
    # Never request more than 90% of physical VMEM (100 MiB > v7x's 64 MiB was invalid).
    return int(min(max(est, 32 << 20), int(0.9 * cap)))


def _single_vmem_estimate(Np, Mp, Dp, itemsize, need_second):
    k = 3 if need_second else 2
    io = 2 * ((Np * Dp + Dp * Mp) * itemsize        # double-buffered inputs
              + 2 * Np * Mp * itemsize              # double-buffered sim + la outputs
              + (Np * k + k * Mp) * 4)              # stats outputs
    temps = 4 * Np * Mp * 4                         # f32 sim + transient elementwise temps
    return io + temps + (2 << 20)


def _tiled_vmem_estimate(TN, Mp, Dp, itemsize, need_second):
    k = (3 if need_second else 2) + 1
    io = 2 * ((TN * Dp + Dp * Mp) * itemsize
              + TN * Mp * itemsize
              + (TN * k + k * Mp) * 4)
    temps = 4 * TN * Mp * 4
    return io + temps + (2 << 20)


# --------------------------------------------------------------------------------------
# Kernels
# --------------------------------------------------------------------------------------

def _mnn_single_kernel(d0_ref, d1t_ref, sim_ref, la_ref, rstats_ref, cstats_ref,
                       *, n_valid, m_valid, need_second):
    d0 = d0_ref[0]            # (Np, Dp)
    d1t = d1t_ref[0]          # (Dp, Mp)

    # Similarity on the MXU: (Np, Dp) @ (Dp, Mp), f32 accumulation.  desc1 was
    # pre-transposed in the wrapper so no in-kernel relayout of the RHS is needed.
    sim = jax.lax.dot_general(d0, d1t, (((1,), (0,)), ((), ())),
                              preferred_element_type=jnp.float32)       # (Np, Mp)
    Np, Mp = sim.shape
    f32 = jnp.float32
    neg_inf = f32(-jnp.inf)

    # Broadcast iotas only: (1, Mp) lane iota + (Np, 1) sublane iota.
    col_ids = jax.lax.broadcasted_iota(jnp.int32, (1, Mp), 1).astype(f32)
    row_ids = jax.lax.broadcasted_iota(jnp.int32, (Np, 1), 0).astype(f32)

    # Mask padded rows / columns so they never win a max or contribute to softmax sums.
    if n_valid < Np:
        sim = jnp.where(row_ids < f32(n_valid), sim, neg_inf)
    if m_valid < Mp:
        sim = jnp.where(col_ids < f32(m_valid), sim, neg_inf)

    sim_ref[0] = sim.astype(sim_ref.dtype)

    # --- best (and optional second-best) match along rows: for each n, best m ---
    max0_r = jnp.max(sim, axis=1, keepdims=True)                         # (Np, 1)
    idx0_r = jnp.min(jnp.where(sim == max0_r, col_ids, f32(Mp)),
                     axis=1, keepdims=True)                              # (Np, 1)
    rstats_ref[0, :, 0:1] = idx0_r
    rstats_ref[0, :, 1:2] = max0_r
    if need_second:
        max1_r = jnp.max(jnp.where(col_ids == idx0_r, neg_inf, sim),
                         axis=1, keepdims=True)
        rstats_ref[0, :, 2:3] = max1_r

    # --- best (and optional second-best) match along columns: for each m, best n ---
    max0_c = jnp.max(sim, axis=0, keepdims=True)                         # (1, Mp)
    idx0_c = jnp.min(jnp.where(sim == max0_c, row_ids, f32(Np)),
                     axis=0, keepdims=True)                              # (1, Mp)
    cstats_ref[0, 0:1, :] = idx0_c
    cstats_ref[0, 1:2, :] = max0_c
    if need_second:
        max1_c = jnp.max(jnp.where(row_ids == idx0_c, neg_inf, sim),
                         axis=0, keepdims=True)
        cstats_ref[0, 2:3, :] = max1_c

    # --- log_softmax(sim, -1) + log_softmax(sim, -2), per-axis max shifts (safe even
    #     for unnormalized descriptors; padded rows/cols only produce NaN in the padded
    #     region, which is sliced away by the wrapper) ---
    lse_r = jnp.log(jnp.sum(jnp.exp(sim - max0_r), axis=1, keepdims=True)) + max0_r
    lse_c = jnp.log(jnp.sum(jnp.exp(sim - max0_c), axis=0, keepdims=True)) + max0_c
    la_ref[0] = (2.0 * sim - (lse_r + lse_c)).astype(la_ref.dtype)


def _mnn_tiled_kernel(d0_ref, d1t_ref, sim_ref, rstats_ref, cpart_ref,
                      *, n_valid, m_valid, n_padded, tile_n, need_second):
    d0 = d0_ref[0]            # (TN, Dp)
    d1t = d1t_ref[0]          # (Dp, Mp)

    sim = jax.lax.dot_general(d0, d1t, (((1,), (0,)), ((), ())),
                              preferred_element_type=jnp.float32)       # (TN, Mp)
    TN, Mp = sim.shape
    f32 = jnp.float32
    neg_inf = f32(-jnp.inf)

    row_base = (pl.program_id(1) * tile_n).astype(f32)
    col_ids = jax.lax.broadcasted_iota(jnp.int32, (1, Mp), 1).astype(f32)
    row_ids = jax.lax.broadcasted_iota(jnp.int32, (TN, 1), 0).astype(f32) + row_base

    if n_valid < n_padded:
        sim = jnp.where(row_ids < f32(n_valid), sim, neg_inf)
    if m_valid < Mp:
        sim = jnp.where(col_ids < f32(m_valid), sim, neg_inf)

    sim_ref[0] = sim.astype(sim_ref.dtype)

    # Row direction is complete within one tile (all M columns present).
    max0_r = jnp.max(sim, axis=1, keepdims=True)                         # (TN, 1)
    idx0_r = jnp.min(jnp.where(sim == max0_r, col_ids, f32(Mp)),
                     axis=1, keepdims=True)
    rstats_ref[0, :, 0:1] = idx0_r
    rstats_ref[0, :, 1:2] = max0_r
    lse_col = 2
    if need_second:
        max1_r = jnp.max(jnp.where(col_ids == idx0_r, neg_inf, sim),
                         axis=1, keepdims=True)
        rstats_ref[0, :, 2:3] = max1_r
        lse_col = 3
    lse_r = jnp.log(jnp.sum(jnp.exp(sim - max0_r), axis=1, keepdims=True)) + max0_r
    rstats_ref[0, :, lse_col:lse_col + 1] = lse_r

    # Column direction: per-tile partials, combined across row tiles by the wrapper.
    cmax = jnp.max(sim, axis=0, keepdims=True)                           # (1, Mp)
    cidx = jnp.min(jnp.where(sim == cmax, row_ids, f32(n_padded)),
                   axis=0, keepdims=True)
    cpart_ref[0, 0, 0:1, :] = cidx
    cpart_ref[0, 0, 1:2, :] = cmax
    sum_row = 2
    if need_second:
        csec = jnp.max(jnp.where(row_ids == cidx, neg_inf, sim),
                       axis=0, keepdims=True)
        cpart_ref[0, 0, 2:3, :] = csec
        sum_row = 3
    # Guard all-(-inf) columns so the cross-tile combine never sees NaN.
    shifted = jnp.where(cmax > neg_inf, sim - cmax, neg_inf)
    cpart_ref[0, 0, sum_row:sum_row + 1, :] = jnp.sum(jnp.exp(shifted), axis=0,
                                                      keepdims=True)


# --------------------------------------------------------------------------------------
# Wrappers
# --------------------------------------------------------------------------------------

def _prep_inputs(desc0, desc1, Np, Mp, Dp):
    B, N, D = desc0.shape
    _, M, _ = desc1.shape
    d0 = desc0
    if (Np, Dp) != (N, D):
        d0 = jnp.pad(d0, ((0, 0), (0, Np - N), (0, Dp - D)))
    # Pre-transpose the RHS so the kernel does a plain (Np,Dp)@(Dp,Mp) contraction.
    d1t = jnp.swapaxes(desc1, 1, 2)                     # (B, D, M)
    if (Dp, Mp) != (D, M):
        d1t = jnp.pad(d1t, ((0, 0), (0, Dp - D), (0, Mp - M)))
    return d0, d1t


def _mnn_single(desc0, desc1, *, need_second):
    B, N, D = desc0.shape
    _, M, _ = desc1.shape
    out_dtype = desc0.dtype
    Np = max(_round_up(N, 8), 8)
    Mp = max(_round_up(M, 128), 128)
    Dp = max(_round_up(D, 128), 128)
    d0, d1t = _prep_inputs(desc0, desc1, Np, Mp, Dp)
    k = 3 if need_second else 2

    kernel = functools.partial(_mnn_single_kernel, n_valid=N, m_valid=M,
                               need_second=need_second)
    bmap = lambda b: (b, 0, 0)
    out_shape = (
        jax.ShapeDtypeStruct((B, Np, Mp), out_dtype),       # similarity
        jax.ShapeDtypeStruct((B, Np, Mp), out_dtype),       # log-assignment inner block
        jax.ShapeDtypeStruct((B, Np, k), jnp.float32),      # row stats: idx, best[, second]
        jax.ShapeDtypeStruct((B, k, Mp), jnp.float32),      # col stats: idx, best[, second]
    )
    grid_spec = pltpu.PrefetchScalarGridSpec(
        num_scalar_prefetch=0,
        grid=(B,),
        in_specs=[pl.BlockSpec((1, Np, Dp), bmap),
                  pl.BlockSpec((1, Dp, Mp), bmap)],
        out_specs=[pl.BlockSpec((1, Np, Mp), bmap),
                   pl.BlockSpec((1, Np, Mp), bmap),
                   pl.BlockSpec((1, Np, k), bmap),
                   pl.BlockSpec((1, k, Mp), bmap)])

    cap = _vmem_capacity_bytes()
    est = _single_vmem_estimate(Np, Mp, Dp, jnp.dtype(out_dtype).itemsize, need_second)
    sim, la, rstats, cstats = pl.pallas_call(
        kernel,
        out_shape=out_shape,
        grid_spec=grid_spec,
        compiler_params=pltpu.CompilerParams(
            dimension_semantics=("parallel",),
            vmem_limit_bytes=_vmem_limit(est, cap)),
    )(d0, d1t)

    sim = sim[:, :N, :M]
    la = la[:, :N, :M]
    m0_idx = rstats[:, :N, 0].astype(jnp.int32)
    m0_s1 = rstats[:, :N, 1]
    m0_s2 = rstats[:, :N, 2] if need_second else m0_s1
    m1_idx = cstats[:, 0, :M].astype(jnp.int32)
    m1_s1 = cstats[:, 1, :M]
    m1_s2 = cstats[:, 2, :M] if need_second else m1_s1
    return sim, la, m0_idx, m0_s1, m0_s2, m1_idx, m1_s1, m1_s2


def _mnn_tiled(desc0, desc1, *, need_second, row_tile):
    B, N, D = desc0.shape
    _, M, _ = desc1.shape
    out_dtype = desc0.dtype
    TN = max(_round_up(row_tile, 8), 8)
    T = -(-N // TN)
    Np = T * TN
    Mp = max(_round_up(M, 128), 128)
    Dp = max(_round_up(D, 128), 128)
    d0, d1t = _prep_inputs(desc0, desc1, Np, Mp, Dp)
    kr = (3 if need_second else 2) + 1        # idx, best[, second], lse_r
    kc = (3 if need_second else 2) + 1        # idx, best[, second], sum(exp(sim - best))

    kernel = functools.partial(_mnn_tiled_kernel, n_valid=N, m_valid=M,
                               n_padded=Np, tile_n=TN, need_second=need_second)
    out_shape = (
        jax.ShapeDtypeStruct((B, Np, Mp), out_dtype),        # similarity
        jax.ShapeDtypeStruct((B, Np, kr), jnp.float32),      # per-row stats
        jax.ShapeDtypeStruct((B, T, kc, Mp), jnp.float32),   # per-tile column partials
    )
    grid_spec = pltpu.PrefetchScalarGridSpec(
        num_scalar_prefetch=0,
        grid=(B, T),
        in_specs=[pl.BlockSpec((1, TN, Dp), lambda b, t: (b, t, 0)),
                  pl.BlockSpec((1, Dp, Mp), lambda b, t: (b, 0, 0))],
        out_specs=[pl.BlockSpec((1, TN, Mp), lambda b, t: (b, t, 0)),
                   pl.BlockSpec((1, TN, kr), lambda b, t: (b, t, 0)),
                   pl.BlockSpec((1, 1, kc, Mp), lambda b, t: (b, t, 0, 0))])

    cap = _vmem_capacity_bytes()
    est = _tiled_vmem_estimate(TN, Mp, Dp, jnp.dtype(out_dtype).itemsize, need_second)
    sim, rstats, cpart = pl.pallas_call(
        kernel,
        out_shape=out_shape,
        grid_spec=grid_spec,
        compiler_params=pltpu.CompilerParams(
            # N-tile axis is parallel: both v7x TensorCores are used even when B == 1.
            dimension_semantics=("parallel", "parallel"),
            vmem_limit_bytes=_vmem_limit(est, cap)),
    )(d0, d1t)

    sim = sim[:, :N, :M]
    m0_idx = rstats[:, :N, 0].astype(jnp.int32)
    m0_s1 = rstats[:, :N, 1]
    m0_s2 = rstats[:, :N, 2] if need_second else m0_s1
    lse_r = rstats[:, :N, kr - 1]                                # (B, N)

    # Combine per-tile column partials (tiny: (B, T, kc, M)).
    cpart = cpart[..., :M]
    cidx_t = cpart[:, :, 0, :]
    cmax_t = cpart[:, :, 1, :]
    csum_t = cpart[:, :, kc - 1, :]
    gmax = jnp.max(cmax_t, axis=1)                               # (B, M)
    m1_idx = jnp.min(jnp.where(cmax_t == gmax[:, None, :], cidx_t, jnp.float32(Np)),
                     axis=1).astype(jnp.int32)
    scale = jnp.exp(jnp.where(cmax_t > -jnp.inf,
                              cmax_t - gmax[:, None, :], -jnp.inf))
    lse_c = jnp.log(jnp.sum(csum_t * scale, axis=1)) + gmax      # (B, M)
    m1_s1 = gmax
    if need_second:
        csec_t = cpart[:, :, 2, :]
        cand = jnp.concatenate([cmax_t, csec_t], axis=1)         # (B, 2T, M)
        m1_s2 = jnp.sort(cand, axis=1)[:, -2, :]
    else:
        m1_s2 = m1_s1

    # Cheap second elementwise pass (XLA): la = 2*sim - lse_r - lse_c.
    la = (2.0 * sim.astype(jnp.float32)
          - lse_r[:, :, None] - lse_c[:, None, :]).astype(out_dtype)
    return sim, la, m0_idx, m0_s1, m0_s2, m1_idx, m1_s1, m1_s2


def _mnn_pallas(desc0, desc1, *, need_second, force_row_tile=None):
    B, N, D = desc0.shape
    _, M, _ = desc1.shape
    assert max(N, M) < (1 << 24), "indices are carried as f32 (exact below 2**24)"
    if force_row_tile is not None:
        return _mnn_tiled(desc0, desc1, need_second=need_second, row_tile=force_row_tile)

    Np = max(_round_up(N, 8), 8)
    Mp = max(_round_up(M, 128), 128)
    Dp = max(_round_up(D, 128), 128)
    itemsize = jnp.dtype(desc0.dtype).itemsize
    budget = int(0.75 * _vmem_capacity_bytes())
    if _single_vmem_estimate(Np, Mp, Dp, itemsize, need_second) <= budget:
        return _mnn_single(desc0, desc1, need_second=need_second)
    # Row-tiled fallback for large N*M (mandatory on v7x's 64 MiB VMEM).
    tn = 512                                  # 128-aligned tiles (kind to v5e's 4x128 MXU)
    while tn > 8 and _tiled_vmem_estimate(tn, Mp, Dp, itemsize, need_second) > budget:
        tn //= 2
    # TODO(synk): for extreme M (desc1^T block alone over budget) add a column-tile axis
    # with running row-direction accumulators as well.
    return _mnn_tiled(desc0, desc1, need_second=need_second, row_tile=tn)


# --------------------------------------------------------------------------------------
# Post-processing (plain JAX) and module
# --------------------------------------------------------------------------------------

def _apply_thresholds(idx, s1, s2, ratio_thresh, distance_thresh):
    """find_nn semantics: threshold on distance = 2*(1 - sim)."""
    matches = idx
    if ratio_thresh or distance_thresh:
        d1 = 2.0 * (1.0 - s1)
        d2 = 2.0 * (1.0 - s2)
        mask = jnp.ones(idx.shape, dtype=bool)
        if ratio_thresh:
            mask = mask & (d1 <= (ratio_thresh ** 2) * d2)
        if distance_thresh:
            mask = mask & (d1 <= distance_thresh ** 2)
        matches = jnp.where(mask, idx, -1)
    return matches


def _mutual_check(m0, m1):
    N = m0.shape[-1]
    M = m1.shape[-1]
    inds0 = jnp.arange(N, dtype=m0.dtype)
    inds1 = jnp.arange(M, dtype=m1.dtype)
    loop0 = jnp.take_along_axis(m1, jnp.where(m0 > -1, m0, 0), axis=-1)
    loop1 = jnp.take_along_axis(m0, jnp.where(m1 > -1, m1, 0), axis=-1)
    m0_new = jnp.where((m0 > -1) & (inds0[None, :] == loop0), m0, -1)
    m1_new = jnp.where((m1 > -1) & (inds1[None, :] == loop1), m1, -1)
    return m0_new, m1_new


class NearestNeighborMatcher:
    """JAX/Pallas port of the PyTorch NearestNeighborMatcher forward pass."""

    def __init__(self, ratio_thresh=None, distance_thresh=None, mutual_check=True,
                 _force_row_tile=None):
        self.ratio_thresh = ratio_thresh
        self.distance_thresh = distance_thresh
        self.mutual_check = mutual_check
        self._force_row_tile = _force_row_tile   # private knob (testing / manual tiling)

    def __call__(self, feats0, feats1):
        desc0 = feats0['sparse_descriptors']   # (B, N, D)
        desc1 = feats1['sparse_descriptors']   # (B, M, D)
        kpts0 = feats0['sparse_positions']     # (B, N, 3)
        kpts1 = feats1['sparse_positions']     # (B, M, 3)

        # TODO(synk): reference has a dynamic "no keypoints" early-exit branch (prints and
        # returns zero-filled outputs / python lists); with static JAX shapes it is omitted.

        (sim, la_inner,
         m0_idx, m0_s1, m0_s2,
         m1_idx, m1_s1, m1_s2) = _mnn_pallas(
            desc0, desc1,
            need_second=bool(self.ratio_thresh),
            force_row_tile=self._force_row_tile)

        matches0 = _apply_thresholds(m0_idx, m0_s1, m0_s2,
                                     self.ratio_thresh, self.distance_thresh)   # (B, N)
        matches1 = _apply_thresholds(m1_idx, m1_s1, m1_s2,
                                     self.ratio_thresh, self.distance_thresh)   # (B, M)

        if self.mutual_check:
            matches0, matches1 = _mutual_check(matches0, matches1)

        # log_assignment: pad inner (N, M) block with a zero dustbin row/col.
        la = jnp.pad(la_inner, ((0, 0), (0, 1), (0, 1)))

        mscores0 = (matches0 > -1).astype(jnp.float32)
        mscores1 = (matches1 > -1).astype(jnp.float32)

        # TODO(synk): the reference returns variable-length stacks of matched keypoints
        # (dynamic shapes); here we return fixed-shape masked gathers plus a validity mask.
        valid0 = matches0 > -1
        safe0 = jnp.where(valid0, matches0, 0)
        matched_kpts0 = jnp.where(valid0[..., None], kpts0, 0.0)
        matched_kpts1 = jnp.where(valid0[..., None],
                                  jnp.take_along_axis(kpts1, safe0[..., None], axis=1),
                                  0.0)

        return {
            'matches0': matches0,
            'matches1': matches1,
            'matching_scores0': mscores0,
            'matching_scores1': mscores1,
            'matched_kpts0': matched_kpts0,
            'matched_kpts1': matched_kpts1,
            'valid_matches0': valid0,
            'similarity': sim,
            'log_assignment': la,
        }


# --------------------------------------------------------------------------------------
# Self-test
# --------------------------------------------------------------------------------------

def _ref_matches_from_sim(sim, ratio_thresh, distance_thresh, mutual):
    """Reference matches computed directly from a similarity matrix (pure JAX)."""
    def one_direction(s):
        s1 = jnp.max(s, axis=-1)
        idx = jnp.argmax(s, axis=-1).astype(jnp.int32)
        s2 = jnp.sort(s, axis=-1)[..., -2] if ratio_thresh else s1
        return _apply_thresholds(idx, s1, s2, ratio_thresh, distance_thresh)
    m0 = one_direction(sim)
    m1 = one_direction(jnp.swapaxes(sim, 1, 2))
    if mutual:
        m0, m1 = _mutual_check(m0, m1)
    return m0, m1


if __name__ == "__main__":
    key = jax.random.PRNGKey(0)
    B, N, M, D = 2, 13, 21, 32      # deliberately non-aligned: exercises row/col masking
    k0, k1, k2, k3 = jax.random.split(key, 4)

    desc0 = jax.random.normal(k0, (B, N, D), dtype=jnp.float32)
    desc1 = jax.random.normal(k1, (B, M, D), dtype=jnp.float32)
    desc0 = desc0 / jnp.linalg.norm(desc0, axis=-1, keepdims=True)
    desc1 = desc1 / jnp.linalg.norm(desc1, axis=-1, keepdims=True)
    kpts0 = jax.random.uniform(k2, (B, N, 3), dtype=jnp.float32)
    kpts1 = jax.random.uniform(k3, (B, M, 3), dtype=jnp.float32)
    f0 = {'sparse_descriptors': desc0, 'sparse_positions': kpts0}
    f1 = {'sparse_descriptors': desc1, 'sparse_positions': kpts1}

    # 1) default (single-block) path, mutual NN.
    out = NearestNeighborMatcher(mutual_check=True)(f0, f1)
    jax.block_until_ready(out)
    sim_k = out['similarity']
    assert sim_k.shape == (B, N, M)
    sim_ref = jnp.einsum('bnd,bmd->bnm', desc0, desc1, precision='highest')
    assert jnp.allclose(sim_k, sim_ref, atol=2e-3, rtol=2e-3)
    la_ref = jax.nn.log_softmax(sim_k, -1) + jax.nn.log_softmax(sim_k, -2)
    assert out['log_assignment'].shape == (B, N + 1, M + 1)
    assert jnp.allclose(out['log_assignment'][:, :-1, :-1], la_ref, atol=1e-4)
    assert jnp.allclose(out['log_assignment'][:, -1, :], 0.0)
    assert jnp.allclose(out['log_assignment'][:, :, -1], 0.0)
    m0_ref, m1_ref = _ref_matches_from_sim(sim_k, None, None, True)
    assert jnp.array_equal(out['matches0'], m0_ref)
    assert jnp.array_equal(out['matches1'], m1_ref)
    assert int(jnp.sum(out['matches0'] > -1)) == int(jnp.sum(out['matches1'] > -1))

    # 2) forced row-tiled path must agree with the single-block path.
    out_t = NearestNeighborMatcher(mutual_check=True, _force_row_tile=8)(f0, f1)
    jax.block_until_ready(out_t)
    assert jnp.allclose(out_t['similarity'], sim_k, atol=1e-5)
    assert jnp.allclose(out_t['log_assignment'], out['log_assignment'], atol=1e-4)
    assert jnp.array_equal(out_t['matches0'], out['matches0'])
    assert jnp.array_equal(out_t['matches1'], out['matches1'])

    # 3) ratio + distance thresholds (top-2 path), single block.
    rt, dt = 0.95, 1.4
    out_r = NearestNeighborMatcher(ratio_thresh=rt, distance_thresh=dt,
                                   mutual_check=True)(f0, f1)
    jax.block_until_ready(out_r)
    m0_r, m1_r = _ref_matches_from_sim(out_r['similarity'], rt, dt, True)
    assert jnp.array_equal(out_r['matches0'], m0_r)
    assert jnp.array_equal(out_r['matches1'], m1_r)

    # 4) ratio + distance thresholds, forced row-tiled path.
    out_rt = NearestNeighborMatcher(ratio_thresh=rt, distance_thresh=dt,
                                    mutual_check=True, _force_row_tile=8)(f0, f1)
    jax.block_until_ready(out_rt)
    assert jnp.array_equal(out_rt['matches0'], out_r['matches0'])
    assert jnp.array_equal(out_rt['matches1'], out_r['matches1'])

    print("KERNEL_OK")
</pallas_src>

<mosaic_0001>
module attributes {stable_mosaic.version = 11 : i64} {
  func.func @_mnn_single_kernel(%arg0: i32, %arg1: memref<1x16x128xf32, #tpu.memory_space<vmem>>, %arg2: memref<1x128x128xf32, #tpu.memory_space<vmem>>, %arg3: memref<1x16x128xf32, #tpu.memory_space<vmem>>, %arg4: memref<1x16x128xf32, #tpu.memory_space<vmem>>, %arg5: memref<1x16x2xf32, #tpu.memory_space<vmem>>, %arg6: memref<1x2x128xf32, #tpu.memory_space<vmem>>) attributes {dimension_semantics = [#tpu.dimension_semantics<parallel>], iteration_bounds = array<i64: 2>, scalar_prefetch = 0 : i64, scratch_operands = 0 : i64, tpu.core_type = #tpu.core_type<tc>, window_params = [{transform_indices = @transform_0, window_bounds = array<i64: 1, 16, 128>}, {transform_indices = @transform_1, window_bounds = array<i64: 1, 128, 128>}, {transform_indices = @transform_2, window_bounds = array<i64: 1, 16, 128>}, {transform_indices = @transform_3, window_bounds = array<i64: 1, 16, 128>}, {transform_indices = @transform_4, window_bounds = array<i64: 1, 16, 2>}, {transform_indices = @transform_5, window_bounds = array<i64: 1, 2, 128>}]} {
    %c0 = arith.constant 0 : index
    %c0_0 = arith.constant 0 : index
    %c0_1 = arith.constant 0 : index
    %0 = vector.load %arg1[%c0, %c0_0, %c0_1] : memref<1x16x128xf32, #tpu.memory_space<vmem>>, vector<1x16x128xf32>
    %1 = vector.shape_cast %0 : vector<1x16x128xf32> to vector<16x128xf32>
    %c0_2 = arith.constant 0 : index
    %c0_3 = arith.constant 0 : index
    %c0_4 = arith.constant 0 : index
    %2 = vector.load %arg2[%c0_2, %c0_3, %c0_4] : memref<1x128x128xf32, #tpu.memory_space<vmem>>, vector<1x128x128xf32>
    %3 = vector.shape_cast %2 : vector<1x128x128xf32> to vector<128x128xf32>
    %cst = arith.constant dense<0.000000e+00> : vector<16x128xf32>
    %4 = tpu.matmul %1, %3, %cst {dimension_numbers = #tpu.dot_dimension_numbers<[1], [0], [0], [1], [0, 0, 1, 1], [], []>} : vector<16x128xf32>, vector<128x128xf32>, vector<16x128xf32> -> vector<16x128xf32>
    %5 = tpu.iota {dimensions = array<i32: 1>} : vector<1x128xi32>
    %6 = arith.sitofp %5 : vector<1x128xi32> to vector<1x128xf32>
    %7 = tpu.iota {dimensions = array<i32: 0>} : vector<16x1xi32>
    %8 = arith.sitofp %7 : vector<16x1xi32> to vector<16x1xf32>
    %cst_5 = arith.constant 1.300000e+01 : f32
    %9 = vector.broadcast %cst_5 : f32 to vector<16x1xf32>
    %10 = arith.cmpf olt, %8, %9 : vector<16x1xf32>
    %cst_6 = arith.constant 0xFF800000 : f32
    %11 = vector.shape_cast %10 : vector<16x1xi1> to vector<16x1xi1>
    %12 = vector.broadcast %11 : vector<16x1xi1> to vector<16x128xi1>
    %13 = vector.broadcast %cst_6 : f32 to vector<16x128xf32>
    %14 = arith.select %12, %4, %13 : vector<16x128xi1>, vector<16x128xf32>
    %cst_7 = arith.constant 2.100000e+01 : f32
    %15 = vector.broadcast %cst_7 : f32 to vector<1x128xf32>
    %16 = arith.cmpf olt, %6, %15 : vector<1x128xf32>
    %cst_8 = arith.constant 0xFF800000 : f32
    %17 = vector.shape_cast %16 : vector<1x128xi1> to vector<1x128xi1>
    %18 = vector.broadcast %17 : vector<1x128xi1> to vector<16x128xi1>
    %19 = vector.broadcast %cst_8 : f32 to vector<16x128xf32>
    %20 = arith.select %18, %14, %19 : vector<16x128xi1>, vector<16x128xf32>
    %c0_9 = arith.constant 0 : index
    %c0_10 = arith.constant 0 : index
    %c0_11 = arith.constant 0 : index
    %21 = vector.load %arg3[%c0_9, %c0_10, %c0_11] : memref<1x16x128xf32, #tpu.memory_space<vmem>>, vector<1x16x128xf32>
    %22 = vector.shape_cast %21 : vector<1x16x128xf32> to vector<16x128xf32>
    %23 = vector.shape_cast %20 : vector<16x128xf32> to vector<1x16x128xf32>
    tpu.vector_store %arg3[%c0_9, %c0_10, %c0_11], %23 {strides = array<i32>} : memref<1x16x128xf32, #tpu.memory_space<vmem>>, vector<1x16x128xf32>,
    %cst_12 = arith.constant dense<0xFF800000> : vector<16xf32>
    %24 = vector.multi_reduction <maximumf>, %20, %cst_12 [1] : vector<16x128xf32> to vector<16xf32>
    %25 = vector.shape_cast %24 : vector<16xf32> to vector<16x1xf32>
    %26 = vector.broadcast %25 : vector<16x1xf32> to vector<16x128xf32>
    %27 = arith.cmpf oeq, %20, %26 : vector<16x128xf32>
    %cst_13 = arith.constant 1.280000e+02 : f32
    %28 = vector.shape_cast %6 : vector<1x128xf32> to vector<1x128xf32>
    %29 = vector.broadcast %28 : vector<1x128xf32> to vector<16x128xf32>
    %30 = vector.broadcast %cst_13 : f32 to vector<16x128xf32>
    %31 = arith.select %27, %29, %30 : vector<16x128xi1>, vector<16x128xf32>
    %cst_14 = arith.constant dense<0x7F800000> : vector<16xf32>
    %32 = vector.multi_reduction <minimumf>, %31, %cst_14 [1] : vector<16x128xf32> to vector<16xf32>
    %33 = vector.shape_cast %32 : vector<16xf32> to vector<16x1xf32>
    %c0_15 = arith.constant 0 : index
    %c0_16 = arith.constant 0 : index
    %c0_17 = arith.constant 0 : index
    %34 = vector.load %arg5[%c0_15, %c0_16, %c0_17] : memref<1x16x2xf32, #tpu.memory_space<vmem>>, vector<1x16x1xf32>
    %35 = vector.shape_cast %34 : vector<1x16x1xf32> to vector<16x1xf32>
    %36 = vector.shape_cast %33 : vector<16x1xf32> to vector<1x16x1xf32>
    tpu.vector_store %arg5[%c0_15, %c0_16, %c0_17], %36 {strides = array<i32>} : memref<1x16x2xf32, #tpu.memory_space<vmem>>, vector<1x16x1xf32>,
    %c0_18 = arith.constant 0 : index
    %c0_19 = arith.constant 0 : index
    %c1 = arith.constant 1 : index
    %37 = vector.load %arg5[%c0_18, %c0_19, %c1] : memref<1x16x2xf32, #tpu.memory_space<vmem>>, vector<1x16x1xf32>
    %38 = vector.shape_cast %37 : vector<1x16x1xf32> to vector<16x1xf32>
    %39 = vector.shape_cast %25 : vector<16x1xf32> to vector<1x16x1xf32>
    tpu.vector_store %arg5[%c0_18, %c0_19, %c1], %39 {strides = array<i32>} : memref<1x16x2xf32, #tpu.memory_space<vmem>>, vector<1x16x1xf32>,
    %cst_20 = arith.constant dense<0xFF800000> : vector<128xf32>
    %40 = vector.multi_reduction <maximumf>, %20, %cst_20 [0] : vector<16x128xf32> to vector<128xf32>
    %41 = vector.shape_cast %40 : vector<128xf32> to vector<1x128xf32>
    %42 = vector.broadcast %41 : vector<1x128xf32> to vector<16x128xf32>
    %43 = arith.cmpf oeq, %20, %42 : vector<16x128xf32>
    %cst_21 = arith.constant 1.600000e+01 : f32
    %44 = vector.shape_cast %8 : vector<16x1xf32> to vector<16x1xf32>
    %45 = vector.broadcast %44 : vector<16x1xf32> to vector<16x128xf32>
    %46 = vector.broadcast %cst_21 : f32 to vector<16x128xf32>
    %47 = arith.select %43, %45, %46 : vector<16x128xi1>, vector<16x128xf32>
    %cst_22 = arith.constant dense<0x7F800000> : vector<128xf32>
    %48 = vector.multi_reduction <minimumf>, %47, %cst_22 [0] : vector<16x128xf32> to vector<128xf32>
    %49 = vector.shape_cast %48 : vector<128xf32> to vector<1x128xf32>
    %c0_23 = arith.constant 0 : index
    %c0_24 = arith.constant 0 : index
    %c0_25 = arith.constant 0 : index
    %50 = vector.load %arg6[%c0_23, %c0_24, %c0_25] : memref<1x2x128xf32, #tpu.memory_space<vmem>>, vector<1x1x128xf32>
    %51 = vector.shape_cast %50 : vector<1x1x128xf32> to vector<1x128xf32>
    %52 = vector.shape_cast %49 : vector<1x128xf32> to vector<1x1x128xf32>
    tpu.vector_store %arg6[%c0_23, %c0_24, %c0_25], %52 {strides = array<i32>} : memref<1x2x128xf32, #tpu.memory_space<vmem>>, vector<1x1x128xf32>,
    %c0_26 = arith.constant 0 : index
    %c1_27 = arith.constant 1 : index
    %c0_28 = arith.constant 0 : index
    %53 = vector.load %arg6[%c0_26, %c1_27, %c0_28] : memref<1x2x128xf32, #tpu.memory_space<vmem>>, vector<1x1x128xf32>
    %54 = vector.shape_cast %53 : vector<1x1x128xf32> to vector<1x128xf32>
    %55 = vector.shape_cast %41 : vector<1x128xf32> to vector<1x1x128xf32>
    tpu.vector_store %arg6[%c0_26, %c1_27, %c0_28], %55 {strides = array<i32>} : memref<1x2x128xf32, #tpu.memory_space<vmem>>, vector<1x1x128xf32>,
    %56 = vector.broadcast %25 : vector<16x1xf32> to vector<16x128xf32>
    %57 = arith.subf %20, %56 : vector<16x128xf32>
    %58 = math.exp %57 : vector<16x128xf32>
    %cst_29 = arith.constant dense<0.000000e+00> : vector<16xf32>
    %59 = vector.multi_reduction <add>, %58, %cst_29 [1] : vector<16x128xf32> to vector<16xf32>
    %60 = vector.shape_cast %59 : vector<16xf32> to vector<16x1xf32>
    %61 = math.log %60 : vector<16x1xf32>
    %62 = arith.addf %61, %25 : vector<16x1xf32>
    %63 = vector.broadcast %41 : vector<1x128xf32> to vector<16x128xf32>
    %64 = arith.subf %20, %63 : vector<16x128xf32>
    %65 = math.exp %64 : vector<16x128xf32>
    %cst_30 = arith.constant dense<0.000000e+00> : vector<128xf32>
    %66 = vector.multi_reduction <add>, %65, %cst_30 [0] : vector<16x128xf32> to vector<128xf32>
    %67 = vector.shape_cast %66 : vector<128xf32> to vector<1x128xf32>
    %68 = math.log %67 : vector<1x128xf32>
    %69 = arith.addf %68, %41 : vector<1x128xf32>
    %cst_31 = arith.constant 2.000000e+00 : f32
    %70 = vector.broadcast %cst_31 : f32 to vector<16x128xf32>
    %71 = arith.mulf %70, %20 : vector<16x128xf32>
    %72 = vector.broadcast %62 : vector<16x1xf32> to vector<16x128xf32>
    %73 = vector.broadcast %69 : vector<1x128xf32> to vector<16x128xf32>
    %74 = arith.addf %72, %73 : vector<16x128xf32>
    %75 = arith.subf %71, %74 : vector<16x128xf32>
    %c0_32 = arith.constant 0 : index
    %c0_33 = arith.constant 0 : index
    %c0_34 = arith.constant 0 : index
    %76 = vector.load %arg4[%c0_32, %c0_33, %c0_34] : memref<1x16x128xf32, #tpu.memory_space<vmem>>, vector<1x16x128xf32>
    %77 = vector.shape_cast %76 : vector<1x16x128xf32> to vector<16x128xf32>
    %78 = vector.shape_cast %75 : vector<16x128xf32> to vector<1x16x128xf32>
    tpu.vector_store %arg4[%c0_32, %c0_33, %c0_34], %78 {strides = array<i32>} : memref<1x16x128xf32, #tpu.memory_space<vmem>>, vector<1x16x128xf32>,
    return
  }
  func.func @transform_0(%arg0: i32) -> (i32, i32, i32) {
    %c0_i32 = arith.constant 0 : i32
    %c0_i32_0 = arith.constant 0 : i32
    %c0_i32_1 = arith.constant 0 : i32
    return %arg0, %c0_i32, %c0_i32_0 : i32, i32, i32
  }
  func.func @transform_1(%arg0: i32) -> (i32, i32, i32) {
    %c0_i32 = arith.constant 0 : i32
    %c0_i32_0 = arith.constant 0 : i32
    %c0_i32_1 = arith.constant 0 : i32
    return %arg0, %c0_i32, %c0_i32_0 : i32, i32, i32
  }
  func.func @transform_2(%arg0: i32) -> (i32, i32, i32) {
    %c0_i32 = arith.constant 0 : i32
    %c0_i32_0 = arith.constant 0 : i32
    %c0_i32_1 = arith.constant 0 : i32
    return %arg0, %c0_i32, %c0_i32_0 : i32, i32, i32
  }
  func.func @transform_3(%arg0: i32) -> (i32, i32, i32) {
    %c0_i32 = arith.constant 0 : i32
    %c0_i32_0 = arith.constant 0 : i32
    %c0_i32_1 = arith.constant 0 : i32
    return %arg0, %c0_i32, %c0_i32_0 : i32, i32, i32
  }
  func.func @transform_4(%arg0: i32) -> (i32, i32, i32) {
    %c0_i32 = arith.constant 0 : i32
    %c0_i32_0 = arith.constant 0 : i32
    %c0_i32_1 = arith.constant 0 : i32
    return %arg0, %c0_i32, %c0_i32_0 : i32, i32, i32
  }
  func.func @transform_5(%arg0: i32) -> (i32, i32, i32) {
    %c0_i32 = arith.constant 0 : i32
    %c0_i32_0 = arith.constant 0 : i32
    %c0_i32_1 = arith.constant 0 : i32
    return %arg0, %c0_i32, %c0_i32_0 : i32, i32, i32
  }
}

</mosaic_0001>

<bundles_post_ra>
// kernel: tpu_custom_call.1
= control target key start
LH: loop header
LB: loop body
LE: loop exit
PB: predicated region body
PF: predicated region fallthrough
CT: control target
= control target key end

     0   :  { %11 = vsyncpa [#allocation3], 0  ;;  %s1554_s0 = inlined_call_operand.hbm [shape: f32[2,16,128], index: 0, kind: input, shape index: {}]   ;;  %s1555_s1 = inlined_call_operand.hbm [shape: f32[2,128,128], index: 1, kind: input, shape index: {}]   ;;  %s1556_s2 = inlined_call_operand.hbm [shape: f32[2,16,128], index: 2, kind: output, shape index: {0}]   ;;  %s1557_s3 = inlined_call_operand.hbm [shape: f32[2,16,128], index: 3, kind: output, shape index: {1}]   ;;  %s1558_s4 = inlined_call_operand.vmem [shape: f32[2,16,2], index: 4, kind: output, shape index: {2}]   ;;  %s1559_s5 = inlined_call_operand.hbm [shape: f32[2,2,128], index: 5, kind: output, shape index: {3}]  }
   0x1   :  { %13 = vsyncpa [#allocation3 + $0x1], 0 }
   0x2   :  { %14 = vsyncpa [#allocation6], 0 }
   0x3   :  { %16 = vsyncpa [#allocation6 + $0x1], 0 }
   0x4   :  { %17 = vsyncpa [#allocation4], 0 }
   0x5   :  { %19 = vsyncpa [#allocation4 + $0x1], 0 }
   0x6   :  { %20 = vsyncpa [#allocation9], 0 }
   0x7   :  { %22 = vsyncpa [#allocation9 + $0x1], 0  ;;  %s1177_s18 = smov 0   ;;  %s1179_s19 = smov 0  }
   0x8   :  { %s1181_s20 = smov 0   ;;  %s1183_s21 = smov 0  }
   0x9 LB: > { %s1198_s22 = sadd.s32 4294967295, %s1136_s21   ;;  %s1561_s23 = sadd.s32 4294967294, %s1136_s21   ;;  %s1136_s21 = sphi %s1183_s21, %s1577_s21   ;;  %s1132_s20 = sphi %s1181_s20, %s1576_s20   ;;  %s1128_s19 = sphi %s1179_s19, %s1575_s19   ;;  %s1124_s18 = sphi %s1177_s18, %s1574_s18  }
   0xa   : > { %s1202_s24 = sadd.s32 1, %s1136_s21   ;;  %s35_s25 = sadd.s32 1, %s1132_s20 }
   0xb   : > { %s32_s26 = ssub.s32 %s1136_s21, %s1202_s24  ;;  %p42_p0 = scmp.ne.s32.totalorder %s1132_s20, %s1128_s19 }
   0xc   : > { %p33_p1 = scmp.eq.s32.totalorder %s32_s26, 0  ;;  %p43_p2 = scmp.eq.s32.totalorder %s1136_s21, 0 }
   0xd   : > { %p48_p3 = scmp.ne.s32.totalorder %s1128_s19, %s1124_s18  ;;  %p49_p4 = scmp.eq.s32.totalorder %s1198_s22, 0 }
   0xe   : > { %s1214_s27 = scalar_select %p33_p1, %s1132_s20, %s35_s25  }
   0xf   : > { %p1216_p5 = por %p43_p2, %p42_p0  ;;  %p1220_p6 = por %p49_p4, %p48_p3 }
  0x10   : > { %p98_p7 = scmp.eq.s32.totalorder %s1198_s22, 1  ;;  %p104_p8 = scmp.eq.s32.totalorder %s1561_s23, 1 }
  0x11   : > { %s1564_s29 = scalar_select %p1220_p6, 1, 0 }
  0x12   : > { %p894_p10 = scmp.lt.s32.totalorder %s1136_s21, 2  ;;  %p1229_p11 = por %p98_p7, %p42_p0 }
  0x13   : > { %p1233_p12 = por %p104_p8, %p48_p3  ;;  %s1238_s7 = sand.u32 1, %s1132_s20  }
  0x14   : > { %s1565_s30 = scalar_select %p1229_p11, 1, 0 }
  0x15   : > { %s1566_s6 = scalar_select %p1233_p12, 1, 0 }
  0x16   : > { %s777_s8 = sshll.u32 %s1136_s21, 8  ;;  %s753_s9 = sshll.u32 %s1238_s7, 4 }
  0x17   : > { %s1245_s12 = scalar_lea.hbm %s1554_s0, %s777_s8  ;;  %s206_s13 = scalar_lea.vmem [#allocation2], %s753_s9 }
  0x18   : > { %s213_s14 = sshll.u32 %s206_s13, 4  ;;  %p1249_p13 = pnand %p894_p10, %p1216_p5  ;;  %s1253_s14 = int_to_ptr.vmem [resolvable:$true] %s213_s14 }
  0x19   : > { %s203_s16 = scalar_lea.sflag [#allocation3], %s1238_s7  ;;  %s946_s17 = scalar_lea.hbm %s1245_s12, 256 }
  0x1a   : > { %p947_p0 = scmp.ne.s32.totalorder %s1245_s12, %s946_s17  ;;  %p948_p1 = pneg %p1249_p13 }
  0x1b   : > { %s951_s28 = scalar_lea.hbm %s1554_s0, 512  ;;  %p952_p4 = scmp.lt.u32.totalorder %s1245_s12, %s1554_s0 }
  0x1c   : > { %p949_p2 = pnand %p948_p1, %p947_p0  ;;  %p953_p5 = scmp.lt.u32.totalorder %s951_s28, %s946_s17 }
  0x1d   : > { %p955_p8 = scmp.lt.u32.totalorder %s946_s17, %s1245_s12 }
  0x1e   : > { %p950_p3 = pneg %p949_p2  ;;  %p954_p7 = por %p953_p5, %p952_p4 }
  0x20   : > { %p956_p10 = por %p955_p8, %p954_p7 }
  0x22   : > { %p957_p9 = pnand %p956_p10, %p950_p3 }
  0x24   : > { %960 = shalt.err (!%p957_p9)
}
  0x25   : > { %s961_s10 = scalar_lea.vmem %s1253_s14, 256  ;;  %s1138_s11 = smov [#allocation2]  }
  0x26   : > { %p962_p0 = scmp.ne.s32.totalorder %s1253_s14, %s961_s10  ;;  %s966_s13 = sshll.u32 %s1138_s11, 4  ;;  %s967_s13 = int_to_ptr.vmem [resolvable:$false] %s966_s13 }
  0x27   : > { %s968_s25 = scalar_lea.vmem %s967_s13, 512  ;;  %p969_p11 = scmp.lt.s32.totalorder %s1253_s14, %s967_s13 }
  0x28   : > { %p964_p2 = pnand %p962_p0, %p948_p1  ;;  %p970_p4 = scmp.lt.s32.totalorder %s968_s25, %s961_s10 }
  0x2a   : > { %p965_p12 = pneg %p964_p2  ;;  %p971_p5 = por %p970_p4, %p969_p11 }
  0x2c   : > { %p972_p7 = pnand %p971_p5, %p965_p12 }
  0x2e   : > { %975 = shalt.err (!%p972_p7)
}
  0x2f   : > { %s1139_s17 = smov 128   ;;  %s1140_s26 = smov 8  }
  0x30   : > { %880 = dma.hbm_to_vmem [thread:$0]  (!%p1249_p13), %s1245_s12, 256, %s1253_s14, %s203_s16, %s1139_s17, %s1139_s17, %s1140_s26  }
  0x31   : > { %p759_p9 = scmp.ge.s32.totalorder %s1136_s21, 1  ;;  %p242_p11 = scmp.lt.s32.totalorder %s1136_s21, 3 }
  0x32   : > { %s756_s28 = sshll.u32 %s1238_s7, 7  ;;  %s778_s9 = sshll.u32 %s1136_s21, 11 }
  0x33   : > { %p1289_p12 = pnand %p759_p9, %p242_p11  ;;  %s227_s10 = scalar_lea.vmem [#allocation5], %s756_s28 }
  0x34   : > { %s234_s11 = sshll.u32 %s227_s10, 4  ;;  %s1297_s23 = scalar_lea.hbm %s1555_s1, %s778_s9  ;;  %s1299_s11 = int_to_ptr.vmem [resolvable:$true] %s234_s11 }
  0x35   : > { %s224_s12 = scalar_lea.sflag [#allocation6], %s1238_s7  ;;  %s976_s14 = scalar_lea.hbm %s1297_s23, 2048 }
  0x36   : > { %p977_p3 = scmp.ne.s32.totalorder %s1297_s23, %s976_s14  ;;  %s981_s10 = scalar_lea.hbm %s1555_s1, 4096 }
  0x37   : > { %p982_p0 = scmp.lt.u32.totalorder %s1297_s23, %s1555_s1  ;;  %p983_p2 = scmp.lt.u32.totalorder %s981_s10, %s976_s14 }
  0x38   : > { %p979_p8 = pnand %p977_p3, %p948_p1  ;;  %p985_p5 = scmp.lt.u32.totalorder %s976_s14, %s1297_s23 }
  0x39   : > { %p984_p4 = por %p983_p2, %p982_p0 }
  0x3a   : > { %p980_p10 = pneg %p979_p8 }
  0x3b   : > { %p986_p7 = por %p985_p5, %p984_p4 }
  0x3d   : > { %p987_p9 = pnand %p986_p7, %p980_p10 }
  0x3f   : > { %990 = shalt.err (!%p987_p9)
}
  0x40   : > { %s991_s25 = scalar_lea.vmem %s1299_s11, 2048  ;;  %s1141_s16 = smov [#allocation5]  }
  0x41   : > { %p992_p11 = scmp.ne.s32.totalorder %s1299_s11, %s991_s25  ;;  %s996_s28 = sshll.u32 %s1141_s16, 4  ;;  %s997_s28 = int_to_ptr.vmem [resolvable:$false] %s996_s28 }
  0x42   : > { %s998_s13 = scalar_lea.vmem %s997_s28, 4096  ;;  %p999_p6 = scmp.lt.s32.totalorder %s1299_s11, %s997_s28 }
  0x43   : > { %p994_p3 = pnand %p992_p11, %p948_p1  ;;  %p1000_p0 = scmp.lt.s32.totalorder %s998_s13, %s991_s25 }
  0x45   : > { %p995_p8 = pneg %p994_p3  ;;  %p1001_p2 = por %p1000_p0, %p999_p6 }
  0x47   : > { %p1002_p4 = pnand %p1001_p2, %p995_p8 }
  0x49   : > { %1005 = shalt.err (!%p1002_p4)
}
  0x4a   : > { %883 = dma.hbm_to_vmem [thread:$0]  (!%p1249_p13), %s1297_s23, 2048, %s1299_s11, %s224_s12, %s1139_s17, %s1139_s17, %s1140_s26  }
  0x4b   : > { %246 = sbr.rel (%p1289_p12) target bundleno = 694 (0x2b6), region = 28  ;;  %s1333_s14 = sand.u32 (!%p1289_p12), 1, %s1128_s19  }
  0x4c   : > { %s1336_s10 = sshll.u32 (!%p1289_p12), %s1333_s14, 4  ;;  %s249_s15 = scalar_lea.sflag (!%p1289_p12), [#allocation3], %s1333_s14 }
  0x4d   : > { %s252_s9 = scalar_lea.vmem (!%p1289_p12), [#allocation2], %s1336_s10  ;;  %p1569_p6 = scmp.ne.s32.totalorder (!%p1289_p12), %s1564_s29, 0 }
  0x52   : > { %1107 = dma.done.wait (%p1569_p6), %s249_s15, 256  }
  0x53   : > { %1109 = vsyncadd (%p1569_p6), %s249_s15, 4294967040  ;;  %s761_s23 = sshll.u32 %s1333_s14, 7  ;;  %s258_s7 = scalar_lea.sflag [#allocation6], %s1333_s14 }
  0x54   : > { %s1346_s17 = scalar_lea.vmem [#allocation5], %s761_s23 }
  0x55   : > { %1111 = dma.done.wait (%p1569_p6), %s258_s7, 2048  }
  0x56   : > { %1113 = vsyncadd (%p1569_p6), %s258_s7, 4294965248  ;;  %v315_v0 = vld [vmem:[%s1346_s17] sm:$0xff]  ;;  %v316_v1 = vld [vmem:[%s1346_s17 + $0x8] sm:$0xff]  ;;  %v406_v26 = vlaneseq  ;;  %s1377_s29 = scalar_lea.vmem [#allocation7], %s1336_s10  ;;  %s764_s26 = sshll.u32 %s1333_s14, 1 }
  0x57   : > { %v317_v2 = vld [vmem:[%s1346_s17 + $0x10] sm:$0xff]  ;;  %v835_v3 = vpack.c.bf16 %v316_v1, %v315_v0  ;;  %v318_v4 = vld [vmem:[%s1346_s17 + $0x18] sm:$0xff]  ;;  %v319_v6 = vld [vmem:[%s1346_s17 + $0x20] sm:$0xff]  ;;  %s1394_s8 = scalar_lea.vmem [#allocation10], %s764_s26  ;;  %s780_s11 = sshll.u32 %s1198_s22, 8 }
  0x58   : > { %v839_v5 = vpack.c.bf16 %v318_v4, %v317_v2  ;;  %v320_v7 = vld [vmem:[%s1346_s17 + $0x28] sm:$0xff]  ;;  %v313_v9 = vld [vmem:[%s252_s9] sm:$0xff]  ;;  %v322_v11 = vld [vmem:[%s1346_s17 + $0x38] sm:$0xff]  ;;  %v410_v27 = vshrl.u32 %v406_v26, 7  ;;  %v407_v29 = vand.u32 127, %v406_v26  ;;  %s1417_s16 = scalar_lea.hbm %s1556_s2, %s780_s11  ;;  %s536_s28 = sshll.u32 %s1377_s29, 4  ;;  %s1420_s28 = int_to_ptr.vmem [resolvable:$true] %s536_s28 }
  0x59   : > { %836 = vmatprep.subr.bf16.mxu0 %v835_v3  ;;  %v843_v8 = vpack.c.bf16 %v320_v7, %v319_v6  ;;  %v321_v10 = vld [vmem:[%s1346_s17 + $0x30] sm:$0xff]  ;;  %832 = vmatprep.mubr.f32.mxu0 %v313_v9  ;;  %v323_v13 = vld [vmem:[%s1346_s17 + $0x40] sm:$0xff]  ;;  %v324_v14 = vld [vmem:[%s1346_s17 + $0x48] sm:$0xff]  ;;  %s508_s13 = scalar_lea.sflag [#allocation4], %s1333_s14  ;;  %s1006_s15 = scalar_lea.vmem %s1420_s28, 256 }
  0x5a   : > { %838 = vmatpush3.bf16.msra.mxu0 %v835_v3  ;;  %v847_v12 = vpack.c.bf16 %v322_v11, %v321_v10  ;;  %v851_v15 = vpack.c.bf16 %v324_v14, %v323_v13  ;;  %v325_v16 = vld [vmem:[%s1346_s17 + $0x50] sm:$0xff]  ;;  %v326_v17 = vld [vmem:[%s1346_s17 + $0x58] sm:$0xff]  ;;  %v327_v19 = vld [vmem:[%s1346_s17 + $0x60] sm:$0xff]  ;;  %v411_v28 = vadd.s32 8, %v410_v27  ;;  %v408_v31 = vcvt.s32.f32 %v407_v29  ;;  %p1007_p13 = scmp.ne.s32.totalorder %s1420_s28, %s1006_s15  ;;  %p1570_p1 = scmp.ne.s32.totalorder %s1565_s30, 0 }
  0x5b   : > { %840 = vmatprep.subr.bf16.mxu0 %v839_v5  ;;  %v855_v18 = vpack.c.bf16 %v326_v17, %v325_v16  ;;  %v328_v20 = vld [vmem:[%s1346_s17 + $0x68] sm:$0xff]  ;;  %v329_v22 = vld [vmem:[%s1346_s17 + $0x70] sm:$0xff]  ;;  %v330_v23 = vld [vmem:[%s1346_s17 + $0x78] sm:$0xff]  ;;  %v412_v32 = vcvt.s32.f32 %v410_v27 }
  0x5c   : > { %v859_v21 = vpack.c.bf16 %v328_v20, %v327_v19  ;;  %v863_v24 = vpack.c.bf16 %v330_v23, %v329_v22  ;;  %v314_v25 = vld [vmem:[%s252_s9 + $0x8] sm:$0xff]  ;;  %v413_v30 = vcvt.s32.f32 %v411_v28  ;;  %vm422_vm1 = vcmp.lt.f32.partialorder %v408_v31, 21.0  ;;  %p1008_p12 = pnand %p1007_p13, %p1570_p1  ;;  %s1142_s9 = smov [#allocation7]  }
  0x5d   : > { %vm414_vm2 = vcmp.lt.f32.partialorder %v412_v32, 13.0  ;;  %s1010_s23 = sshll.u32 %s1142_s9, 4  ;;  %s1011_s23 = int_to_ptr.vmem [resolvable:$false] %s1010_s23 }
  0x5e   : > { %842 = vmatpush3.bf16.msra.mxu0 %v839_v5  ;;  %vm415_vm0 = vcmp.lt.f32.partialorder %v413_v30, 13.0  ;;  %p1009_p10 = pneg %p1008_p12  ;;  %s1012_s7 = scalar_lea.vmem %s1011_s23, 512 }
  0x5f   : > { %844 = vmatprep.subr.bf16.mxu0 %v843_v8  ;;  %p1013_p5 = scmp.lt.s32.totalorder %s1420_s28, %s1011_s23  ;;  %p1014_p7 = scmp.lt.s32.totalorder %s1012_s7, %s1006_s15 }
  0x61   : > { %p1015_p9 = por %p1014_p7, %p1013_p5 }
  0x62   : > { %846 = vmatpush3.bf16.msra.mxu0 %v843_v8 }
  0x63   : > { %848 = vmatprep.subr.bf16.mxu0 %v847_v12  ;;  %p1016_p11 = pnand %p1015_p9, %p1009_p10 }
  0x66   : > { %850 = vmatpush3.bf16.msra.mxu0 %v847_v12 }
  0x67   : > { %852 = vmatprep.subr.bf16.mxu0 %v851_v15 }
  0x6a   : > { %854 = vmatpush3.bf16.msra.mxu0 %v851_v15 }
  0x6b   : > { %856 = vmatprep.subr.bf16.mxu0 %v855_v18 }
  0x6e   : > { %858 = vmatpush3.bf16.msra.mxu0 %v855_v18 }
  0x6f   : > { %860 = vmatprep.subr.bf16.mxu0 %v859_v21 }
  0x72   : > { %862 = vmatpush3.bf16.msra.mxu0 %v859_v21 }
  0x73   : > { %864 = vmatprep.subr.bf16.mxu0 %v863_v24 }
  0x76   : > { %866 = vmatpush3.bf16.msra.mxu0 %v863_v24 }
  0x79   : > { %833 = vmatmul.mubr.f32.vlgmr.msra.gmra.mrb[0].mxu0 %v314_v25 }
 0x14c   : > { %v834_v33 = vpop.f32.mrb[0].mxu0 }
 0x14d   : > { %v421_v34 = vsel %vm415_vm0, %v834_v33, -inf  ;;  %v397_v35 = vpop.f32.mrb[1].mxu0 }
 0x14e   : > { %v1372_v36 = vsel %vm422_vm1, %v421_v34, -inf  ;;  %v420_v37 = vsel %vm414_vm2, %v397_v35, -inf }
 0x14f   : > { %v1374_v38 = vsel %vm422_vm1, %v420_v37, -inf  ;;  %428 = vst [vmem:[%s1377_s29 + $0x8] sm:$0xff] %v1372_v36 }
 0x150   : > { %v447_v39 = vmax.f32 %v1374_v38, %v1372_v36  ;;  %429 = vmax.xlane.f32.xlu0 %v1374_v38  ;;  %427 = vst [vmem:[%s1377_s29] sm:$0xff] %v1374_v38 }
 0x152   : > { %v448_v40 = vrot.slane %v447_v39, 4 }
 0x154   : > { %v449_v41 = vmax.f32 %v447_v39, %v448_v40  ;;  %431 = vmax.xlane.f32.xlu0 %v1372_v36 }
 0x156   : > { %v450_v42 = vrot.slane %v449_v41, 2 }
 0x158   : > { %v451_v43 = vmax.f32 %v449_v41, %v450_v42 }
 0x15a   : > { %v452_v44 = vrot.slane %v451_v43, 1 }
 0x15c   : > { %v1388_v45 = vmax.f32 %v451_v43, %v452_v44 }
 0x15e   : > { %vm454_vm3 = vcmp.eq.f32.partialorder %v1374_v38, %v1388_v45  ;;  %vm455_vm4 = vcmp.eq.f32.partialorder %v1372_v36, %v1388_v45  ;;  %466 = vst [vmem:[%s1394_s8 + $0x1] sm:$0x1] %v1388_v45 }
 0x15f   : > { %v456_v46 = vsel %vm454_vm3, %v412_v32, 16.0  ;;  %v457_v47 = vsel %vm455_vm4, %v413_v30, 16.0 }
 0x160   : > { %v458_v48 = vmin.f32 %v456_v46, %v457_v47 }
 0x162   : > { %v459_v49 = vrot.slane %v458_v48, 4 }
 0x164   : > { %v460_v50 = vmin.f32 %v458_v48, %v459_v49 }
 0x166   : > { %v461_v51 = vrot.slane %v460_v50, 2 }
 0x168   : > { %v462_v52 = vmin.f32 %v460_v50, %v461_v51 }
 0x16a   : > { %v463_v53 = vrot.slane %v462_v52, 1 }
 0x16c   : > { %v464_v54 = vmin.f32 %v462_v52, %v463_v53 }
 0x16e   : > { %465 = vst [vmem:[%s1394_s8] sm:$0x1] %v464_v54 }
 0x1dd   : > { %v1399_v55 = vpop.xlane.xlu0 %429 }
 0x1de   : > { %vm433_vm5 = vcmp.eq.f32.partialorder %v1374_v38, %v1399_v55  ;;  %v467_v56 = vsub.f32 %v1374_v38, %v1399_v55 }
 0x1df   : > { %v435_v57 = vsel %vm433_vm5, %v408_v31, 128.0 }
 0x1e0   : > { %437 = vmin.xlane.f32.xlu0 %v435_v57  ;;  %v469_v58 = vmul.f32 1.442695, %v467_v56 }
 0x1e1   : > { %v1405_v59 = vpop.xlane.xlu0 %431 }
 0x1e2   : > { %v468_v60 = vsub.f32 %v1372_v36, %v1405_v59  ;;  %932 = vpow2.f32 %v469_v58  ;;  %vm434_vm6 = vcmp.eq.f32.partialorder %v1372_v36, %v1405_v59 }
 0x1e3   : > { %v436_v0 = vsel %vm434_vm6, %v408_v31, 128.0 }
 0x1e4   : > { %v471_v61 = vmul.f32 1.442695, %v468_v60 }
 0x1e6   : > { %934 = vpow2.f32 %v471_v61 }
 0x1ec   : > { %v933_v62 = vpop.eup %932 }
 0x1ed   : > { %473 = vadd.xlane.f32.xlu1 %v933_v62 }
 0x1f0   : > { %v935_v63 = vpop.eup %934 }
 0x1f1   : > { %475 = vadd.xlane.f32.xlu1 %v935_v63 }
 0x1f5   : > { %439 = vmin.xlane.f32.xlu1 %v436_v0 }
 0x1f6   : > { %1019 = shalt.err (!%p1016_p11)
}
 0x1f7   : > { %s1020_s17 = scalar_lea.hbm %s1417_s16, 256  ;;  %s1024_s12 = scalar_lea.hbm %s1556_s2, 512 }
 0x1f8   : > { %p1021_p3 = scmp.ne.s32.totalorder %s1417_s16, %s1020_s17  ;;  %p1025_p2 = scmp.lt.u32.totalorder %s1417_s16, %s1556_s2 }
 0x1f9   : > { %p1026_p4 = scmp.lt.u32.totalorder %s1024_s12, %s1020_s17  ;;  %p1028_p13 = scmp.lt.u32.totalorder %s1020_s17, %s1417_s16 }
 0x1fa   : > { %p1022_p8 = pnand %p1021_p3, %p1570_p1 }
 0x1fb   : > { %p1027_p6 = por %p1026_p4, %p1025_p2 }
 0x1fc   : > { %p1023_p0 = pneg %p1022_p8 }
 0x1fd   : > { %p1029_p12 = por %p1028_p13, %p1027_p6 }
 0x1ff   : > { %p1030_p10 = pnand %p1029_p12, %p1023_p0 }
 0x201   : > { %1033 = shalt.err (!%p1030_p10)
}
 0x202   : > { %s1143_s15 = smov 128   ;;  %s1144_s23 = smov 8   ;;  %v483_v1 = vsub.f32 %v1374_v38, %v1388_v45  ;;  %v484_v2 = vsub.f32 %v1372_v36, %v1388_v45  ;;  %vm441_vm7 = vcmask 7168   ;;  %vm444_vm8 = vcmask 15368  }
 0x203   : > { %871 = dma.vmem_to_hbm [thread:$0]  (%p1570_p1), %s1420_s28, 256, %s1417_s16, %s508_s13, %s1143_s15, %s1143_s15, %s1144_s23   ;;  %v499_v25 = vmul.f32 2.0, %v1374_v38  ;;  %v500_v30 = vmul.f32 2.0, %v1372_v36 }
 0x204   : > { %v485_v3 = vmul.f32 1.442695, %v483_v1  ;;  %v487_v4 = vmul.f32 1.442695, %v484_v2  ;;  %p308_p5 = scmp.lt.s32.totalorder %s1198_s22, 1  ;;  %s512_s17 = sand.u32 1, %s1198_s22  }
 0x205   : > { %s293_s29 = scalar_lea.vmem [#allocation8], %s1336_s10  ;;  %s774_s12 = sshll.u32 %s1198_s22, 5 }
 0x206   : > { %936 = vpow2.f32 %v485_v3  ;;  %s309_s7 = scalar_select %p308_p5, %s1198_s22, 1 }
 0x207   : > { %938 = vpow2.f32 %v487_v4  ;;  %s552_s26 = sshll.u32 %s293_s29, 4  ;;  %s571_s25 = sshll.u32 %s1394_s8, 4  ;;  %s1476_s26 = int_to_ptr.vmem [resolvable:$true] %s552_s26  ;;  %s1483_s25 = int_to_ptr.vmem [resolvable:$true] %s571_s25 }
 0x208   : > { %s779_s14 = sshll.u32 %s309_s7, 4  ;;  %s1481_s10 = scalar_lea.hbm %s1559_s5, %s774_s12 }
 0x209   : > { %s312_s13 = scalar_lea.vmem %s1558_s4, %s779_s14  ;;  %s1474_s14 = scalar_lea.hbm %s1557_s3, %s780_s11 }
 0x20a   : > { %s1485_s8 = scalar_lea.sflag [#allocation9], %s512_s17  ;;  %s1034_s22 = scalar_lea.vmem %s1476_s26, 256 }
 0x20b   : > { %p1035_p7 = scmp.ne.s32.totalorder %s1476_s26, %s1034_s22  ;;  %s1145_s11 = smov [#allocation8]  }
 0x20d   : > { %p1036_p9 = pnand %p1035_p7, %p1570_p1 }
 0x20f   : > { %p1037_p11 = pneg %p1036_p9 }
 0x210   : > { %v937_v5 = vpop.eup %936 }
 0x211   : > { %v939_v6 = vpop.eup %938 }
 0x212   : > { %v489_v7 = vadd.f32 %v939_v6, %v937_v5 }
 0x214   : > { %v490_v8 = vrot.slane %v489_v7, 4 }
 0x216   : > { %v491_v9 = vadd.f32 %v490_v8, %v489_v7 }
 0x218   : > { %v492_v10 = vrot.slane %v491_v9, 2 }
 0x21a   : > { %v493_v11 = vadd.f32 %v492_v10, %v491_v9 }
 0x21c   : > { %v494_v13 = vrot.slane %v493_v11, 1 }
 0x21e   : > { %v495_v14 = vadd.f32 %v494_v13, %v493_v11 }
 0x220   : > { %940 = vlog2.f32 %v495_v14 }
 0x22a   : > { %v941_v17 = vpop.eup %940 }
 0x22b   : > { %v497_v19 = vmul.f32 0.6931472, %v941_v17 }
 0x22d   : > { %v498_v23 = vadd.f32 %v497_v19, %v1388_v45 }
 0x26d   : > { %v438_v12 = vpop.xlane.xlu0 %437 }
 0x26e   : > { %442 = vst.msk [vmem:[%s312_s13] sm:$0xff] %vm441_vm7, %v438_v12 }
 0x26f   : > { %445 = vst.msk [vmem:[%s312_s13] sm:$0xff] %vm444_vm8, %v1399_v55 }
 0x27a   : > { %v474_v15 = vpop.xlane.xlu1 %473 }
 0x27b   : > { %942 = vlog2.f32 %v474_v15 }
 0x27e   : > { %v476_v16 = vpop.xlane.xlu1 %475 }
 0x27f   : > { %944 = vlog2.f32 %v476_v16 }
 0x282   : > { %v440_v18 = vpop.xlane.xlu1 %439 }
 0x283   : > { %443 = vst.msk [vmem:[%s312_s13 + $0x8] sm:$0xff] %vm441_vm7, %v440_v18 }
 0x284   : > { %446 = vst.msk [vmem:[%s312_s13 + $0x8] sm:$0xff] %vm444_vm8, %v1405_v59  ;;  %s1038_s13 = sshll.u32 %s1145_s11, 4  ;;  %s1039_s13 = int_to_ptr.vmem [resolvable:$false] %s1038_s13 }
 0x285   : > { %v943_v20 = vpop.eup %942  ;;  %s1040_s9 = scalar_lea.vmem %s1039_s13, 512  ;;  %p1041_p3 = scmp.lt.s32.totalorder %s1476_s26, %s1039_s13 }
 0x286   : > { %v478_v21 = vmul.f32 0.6931472, %v943_v20  ;;  %p1042_p8 = scmp.lt.s32.totalorder %s1040_s9, %s1034_s22 }
 0x288   : > { %v481_v22 = vadd.f32 %v478_v21, %v1399_v55  ;;  %p1043_p0 = por %p1042_p8, %p1041_p3 }
 0x289   : > { %v945_v24 = vpop.eup %944 }
 0x28a   : > { %v501_v26 = vadd.f32 %v498_v23, %v481_v22  ;;  %v480_v27 = vmul.f32 0.6931472, %v945_v24  ;;  %p1044_p2 = pnand %p1043_p0, %p1037_p11 }
 0x28c   : > { %v503_v28 = vsub.f32 %v499_v25, %v501_v26  ;;  %v482_v29 = vadd.f32 %v480_v27, %v1405_v59 }
 0x28e   : > { %505 = vst [vmem:[%s293_s29] sm:$0xff] %v503_v28  ;;  %v502_v31 = vadd.f32 %v498_v23, %v482_v29 }
 0x290   : > { %v504_v32 = vsub.f32 %v500_v30, %v502_v31 }
 0x292   : > { %506 = vst [vmem:[%s293_s29 + $0x8] sm:$0xff] %v504_v32 }
 0x293   : > { %1047 = shalt.err (!%p1044_p2)
}
 0x294   : > { %s1048_s17 = scalar_lea.hbm %s1474_s14, 256  ;;  %s1052_s7 = scalar_lea.hbm %s1557_s3, 512 }
 0x295   : > { %p1049_p4 = scmp.ne.s32.totalorder %s1474_s14, %s1048_s17  ;;  %p1053_p12 = scmp.lt.u32.totalorder %s1474_s14, %s1557_s3 }
 0x296   : > { %p1054_p10 = scmp.lt.u32.totalorder %s1052_s7, %s1048_s17  ;;  %p1056_p7 = scmp.lt.u32.totalorder %s1048_s17, %s1474_s14 }
 0x297   : > { %p1050_p6 = pnand %p1049_p4, %p1570_p1 }
 0x298   : > { %p1055_p5 = por %p1054_p10, %p1053_p12 }
 0x299   : > { %p1051_p13 = pneg %p1050_p6 }
 0x29a   : > { %p1057_p9 = por %p1056_p7, %p1055_p5 }
 0x29c   : > { %p1058_p11 = pnand %p1057_p9, %p1051_p13 }
 0x29e   : > { %1061 = shalt.err (!%p1058_p11)
}
 0x29f   : > { %872 = dma.vmem_to_hbm [thread:$0]  (%p1570_p1), %s1476_s26, 256, %s1474_s14, %s1485_s8, %s1143_s15, %s1143_s15, %s1144_s23  }
 0x2a0   : > { %s1062_s22 = scalar_lea.vmem %s1483_s25, 32  ;;  %s1146_s11 = smov [#allocation10]  }
 0x2a1   : > { %p1063_p3 = scmp.ne.s32.totalorder %s1483_s25, %s1062_s22  ;;  %s1066_s13 = sshll.u32 %s1146_s11, 4  ;;  %s1067_s13 = int_to_ptr.vmem [resolvable:$false] %s1066_s13 }
 0x2a2   : > { %s1068_s9 = scalar_lea.vmem %s1067_s13, 64  ;;  %p1069_p2 = scmp.lt.s32.totalorder %s1483_s25, %s1067_s13 }
 0x2a3   : > { %p1064_p8 = pnand %p1063_p3, %p1570_p1  ;;  %p1070_p4 = scmp.lt.s32.totalorder %s1068_s9, %s1062_s22 }
 0x2a5   : > { %p1065_p0 = pneg %p1064_p8  ;;  %p1071_p6 = por %p1070_p4, %p1069_p2 }
 0x2a7   : > { %p1072_p13 = pnand %p1071_p6, %p1065_p0 }
 0x2a9   : > { %1075 = shalt.err (!%p1072_p13)
}
 0x2aa   : > { %s1076_s15 = scalar_lea.hbm %s1481_s10, 32  ;;  %s1080_s14 = scalar_lea.hbm %s1559_s5, 64 }
 0x2ab   : > { %p1077_p12 = scmp.ne.s32.totalorder %s1481_s10, %s1076_s15  ;;  %p1081_p7 = scmp.lt.u32.totalorder %s1481_s10, %s1559_s5 }
 0x2ac   : > { %p1082_p9 = scmp.lt.u32.totalorder %s1080_s14, %s1076_s15  ;;  %p1084_p3 = scmp.lt.u32.totalorder %s1076_s15, %s1481_s10 }
 0x2ad   : > { %p1078_p10 = pnand %p1077_p12, %p1570_p1 }
 0x2ae   : > { %p1083_p11 = por %p1082_p9, %p1081_p7 }
 0x2af   : > { %p1079_p5 = pneg %p1078_p10 }
 0x2b0   : > { %p1085_p8 = por %p1084_p3, %p1083_p11 }
 0x2b2   : > { %p1086_p0 = pnand %p1085_p8, %p1079_p5 }
 0x2b4   : > { %1089 = shalt.err (!%p1086_p0)
}
 0x2b5   : > { %873 = dma.vmem_to_hbm [thread:$0]  (%p1570_p1), %s1483_s25, 32, %s1481_s10, %s1485_s8  }
 0x2b6 PF: > { %s583_s12 = sand.u32 1, %s1124_s18   ;;  %p1571_p2 = scmp.ne.s32.totalorder %s1566_s6, 0 }
 0x2b7   : > { %p1572_p4 = scmp.ge.s32.totalorder %s1136_s21, 2  ;;  %s584_s7 = scalar_lea.sflag [#allocation4], %s583_s12 }
 0x2b9   : > { %p885_p6 = pnand %p1572_p4, %p1571_p2 }
 0x2bb   : > { %1115 = dma.done.wait (!%p885_p6), %s584_s7, 256  }
 0x2bc   : > { %1117 = vsyncadd (!%p885_p6), %s584_s7, 4294967040  ;;  %s1573_s16 = sadd.s32 4294967294, %s1136_s21  }
 0x2bd   : > { %s592_s28 = sand.u32 1, %s1573_s16  }
 0x2be   : > { %s593_s22 = scalar_lea.sflag [#allocation9], %s592_s28 }
 0x2bf   : > { %1119 = dma.done.wait (!%p885_p6), %s593_s22, 288  }
 0x2c0   : > { %1121 = vsyncadd (!%p885_p6), %s593_s22, 4294967008  ;;  %p25_p1 = scmp.ge.s32.totalorder %s1202_s24, 4   ;;  %s1574_s18 = smov %s1128_s19 }
 0x2c1   : > { %s1575_s19 = smov %s1132_s20  ;;  %s1576_s20 = smov %s1214_s27 }
 0x2c2   : > { %s1577_s21 = smov %s1202_s24  ;;  %27 = sbr.rel (!%p25_p1) target bundleno = 9 (0x9), region = 130 }
 0x2c9   :  { %615 = vsyncpa [#allocation3], 1 }
 0x2ca   :  { %617 = vsyncpa [#allocation3 + $0x1], 1 }
 0x2cb   :  { %618 = vsyncpa [#allocation6], 1 }
 0x2cc   :  { %620 = vsyncpa [#allocation6 + $0x1], 1 }
 0x2cd   :  { %621 = vsyncpa [#allocation4], 1 }
 0x2ce   :  { %623 = vsyncpa [#allocation4 + $0x1], 1 }
 0x2cf   :  { %624 = vsyncpa [#allocation9], 1 }
 0x2d0   :  { %626 = vsyncpa [#allocation9 + $0x1], 1 }

</bundles_post_ra>
